<compile_context>
chip_gen: v6e
topology: v6e:2x2x1
jax: 0.10.0
libtpu: 0.0.40
codegen_flags: <defaults>
</compile_context>

<pallas_src>
import numpy as np
import jax
import jax.numpy as jnp
from jax.experimental import pallas as pl
from jax.experimental.pallas import tpu as pltpu


# ----------------------------------------------------------------------------
# Host-side (numpy) construction of the fused resampling matrices
# ----------------------------------------------------------------------------
def _round_up(x: int, m: int) -> int:
    return ((x + m - 1) // m) * m


def _bilinear_matrix_np(in_size: int, out_size: int) -> np.ndarray:
    """Row-resampling matrix matching F.interpolate(mode='bilinear',
    align_corners=False).  Shape (out_size, in_size), float32."""
    d = np.arange(out_size, dtype=np.float64)
    src = (d + 0.5) * (in_size / out_size) - 0.5
    src = np.maximum(src, 0.0)
    i0 = np.minimum(np.floor(src).astype(np.int64), in_size - 1)
    i1 = np.minimum(i0 + 1, in_size - 1)
    lam = np.clip(src - i0, 0.0, 1.0)
    r = np.zeros((out_size, in_size), dtype=np.float64)
    r[np.arange(out_size), i0] += 1.0 - lam
    r[np.arange(out_size), i1] += lam
    return r.astype(np.float32)


def _nearest_src_np(valid_in: int, out_size: int) -> np.ndarray:
    """Source indices matching F.interpolate(mode='nearest') applied to the
    cropped [:valid_in] region (PyTorch formula: floor(d * in/out))."""
    d = np.arange(out_size, dtype=np.float64)
    return np.minimum(np.floor(d * (valid_in / out_size)).astype(np.int64),
                      valid_in - 1)


def _vmem_capacity_bytes() -> int:
    """Physical VMEM per core (128 MiB on v5e/v6e, 64 MiB on v7x)."""
    try:
        cap = int(pltpu.get_tpu_info().vmem_capacity_bytes)
        if cap > 0:
            return cap
    except Exception:
        pass
    return 64 * 1024 * 1024  # conservative fallback (v7x)


def _pick_lane_chunk(owp: int) -> int:
    """Largest lane-chunk (multiple of 128, <= 512) that divides OWp."""
    for c in (512, 256, 128):
        if c <= owp and owp % c == 0:
            return c
    return owp


# ----------------------------------------------------------------------------
# Fused kernel: (bilinear -> sigmoid -> threshold -> crop -> nearest) per mask
# ----------------------------------------------------------------------------
def fused_segm_postprocess(masks: jnp.ndarray, a: jnp.ndarray, bt: jnp.ndarray,
                           threshold: float) -> jnp.ndarray:
    """masks: (B, Q, H, W) bfloat16 mask logits.
       a:     (B, OHp, H) bfloat16   (rows beyond each image's out_h are zero)
       bt:    (B, W, OWp) bfloat16   (cols beyond each image's out_w are zero)
       returns (B, Qp, OHp, OWp) uint8 binary masks (padded region is junk; the
       caller slices it off)."""
    B, Q, H, W = masks.shape
    ohp = int(a.shape[1])
    owp = int(bt.shape[2])
    # sigmoid(x) > t  <=>  x > logit(t)   (exact; no EUP exp per element)
    logit_thr = float(np.log(threshold) - np.log1p(-threshold))

    # Chunk the second matmul / compare / store over OWp lanes so the f32
    # intermediate per in-flight mask is bounded by OHp*CW*4 bytes.
    cw = _pick_lane_chunk(owp)
    n_chunks = owp // cw

    # --- VMEM-aware choice of nb (masks per grid step) --------------------
    vmem_cap = _vmem_capacity_bytes()
    vmem_limit = int(vmem_cap * 3 // 4)          # ~96 MiB v5e/v6e, ~48 MiB v7x
    out_bufs = 2                                  # double-buffered output block
    bpe_in = 2                                    # bf16 inputs
    # nb-independent VMEM: double-buffered A and Bt blocks + f32 t and s-chunk.
    fixed = (2 * ohp * H * bpe_in) + (2 * W * owp * bpe_in) \
            + (ohp * W * 4) + (ohp * cw * 4)
    # nb-dependent VMEM: double-buffered mask block + buffered uint8 output block.
    per_mask = (2 * H * W * bpe_in) + (out_bufs * ohp * owp)
    budget = int(vmem_limit * 0.6)                # headroom for compiler scratch
    nb = int(max(1, min(Q, (budget - fixed) // max(per_mask, 1))))

    qp = _round_up(Q, nb)
    if qp != Q:
        masks = jnp.pad(masks, ((0, 0), (0, qp - Q), (0, 0), (0, 0)))

    # Unroll only when the whole unrolled f32 footprint stays tiny (small-image
    # case); big cases stay rolled so live ranges never balloon.
    unroll_chunks = bool((n_chunks * ohp * cw * 4) <= (1 << 20))
    unroll_masks = bool(unroll_chunks and nb <= 8 and
                        (nb * (ohp * owp + ohp * W) * 4) <= (1 << 20))

    def kernel(m_ref, a_ref, bt_ref, o_ref):
        a_blk = a_ref[0]                                       # (OHp, H) bf16

        def mask_body(n, carry):
            m = m_ref[0, n]                                    # (H, W) bf16
            t = jnp.dot(a_blk, m,
                        preferred_element_type=jnp.float32)    # (OHp, W) f32
            tb = t.astype(jnp.bfloat16)                        # bf16 for 2nd MXU dot

            def chunk_body(c, carry2):
                start = pl.multiple_of(c * cw, cw)
                bt_c = bt_ref[0, :, pl.ds(start, cw)]          # (W, CW) bf16
                s = jnp.dot(tb, bt_c,
                            preferred_element_type=jnp.float32)  # (OHp, CW) f32
                # bool -> uint8 directly: vcmp + pack, no int32 slab.
                o_ref[0, n, :, pl.ds(start, cw)] = (s > logit_thr).astype(jnp.uint8)
                return carry2

            jax.lax.fori_loop(0, n_chunks, chunk_body, 0, unroll=unroll_chunks)
            return carry

        jax.lax.fori_loop(0, nb, mask_body, 0, unroll=unroll_masks)

    return pl.pallas_call(
        kernel,
        out_shape=jax.ShapeDtypeStruct((B, qp, ohp, owp), jnp.uint8),
        grid=(B, qp // nb),
        in_specs=[
            pl.BlockSpec((1, nb, H, W), lambda b, q: (b, q, 0, 0)),
            pl.BlockSpec((1, ohp, H), lambda b, q: (b, 0, 0)),
            pl.BlockSpec((1, W, owp), lambda b, q: (b, 0, 0)),
        ],
        out_specs=pl.BlockSpec((1, nb, ohp, owp), lambda b, q: (b, q, 0, 0)),
        compiler_params=pltpu.CompilerParams(
            dimension_semantics=("parallel", "parallel"),
            vmem_limit_bytes=vmem_limit),
    )(masks, a, bt)


# ----------------------------------------------------------------------------
# Module wrapper (mirrors PostProcessSegm.forward; no parameters)
# ----------------------------------------------------------------------------
class PostProcessSegm:
    def __init__(self, threshold: float = 0.5):
        self.threshold = threshold

    def __call__(self, results, outputs, orig_target_sizes, max_target_sizes):
        assert len(orig_target_sizes) == len(max_target_sizes)
        mts = np.asarray(max_target_sizes)
        ots = np.asarray(orig_target_sizes)
        max_h, max_w = int(mts[:, 0].max()), int(mts[:, 1].max())

        pred = outputs['pred_masks']                         # [B, Q, 1, H, W]
        B, Q, _, H, W = pred.shape
        # bf16 inputs: native MXU dtype, halves the mask DMA (f32 accumulation
        # inside the kernel keeps the threshold decision accurate).
        masks = jnp.squeeze(pred, 2).astype(jnp.bfloat16)    # (B, Q, H, W)

        # Shared bilinear matrices to the batch-max padded size.
        r_h = _bilinear_matrix_np(H, max_h)                  # (max_h, H)
        r_w = _bilinear_matrix_np(W, max_w)                  # (max_w, W)

        out_hs = [int(v) for v in ots[:, 0]]
        out_ws = [int(v) for v in ots[:, 1]]
        ohp = _round_up(max(out_hs), 32)                     # native u8 sublane tile
        owp = _round_up(max(out_ws), 128)                    # lane-dense output stores

        # Fused per-image matrices: A = S_h @ R_h (nearest+crop over bilinear rows),
        # Bt = (S_w @ R_w)^T.  Padded rows/cols are zero and get sliced off below.
        a = np.zeros((B, ohp, H), dtype=np.float32)
        bt = np.zeros((B, W, owp), dtype=np.float32)
        for i in range(B):
            img_h, img_w = int(mts[i, 0]), int(mts[i, 1])
            oh, ow = out_hs[i], out_ws[i]
            a[i, :oh, :] = r_h[_nearest_src_np(img_h, oh)]
            bt[i, :, :ow] = r_w[_nearest_src_np(img_w, ow)].T

        out = fused_segm_postprocess(masks,
                                     jnp.asarray(a, dtype=jnp.bfloat16),
                                     jnp.asarray(bt, dtype=jnp.bfloat16),
                                     self.threshold)         # (B, Qp, OHp, OWp) u8

        for i in range(B):
            results[i]['masks'] = out[i, :Q, :out_hs[i], :out_ws[i]][:, None, :, :]
        return results


# ----------------------------------------------------------------------------
# Pure-numpy reference (pre-threshold logits) for validation
# ----------------------------------------------------------------------------
def _reference_logits(pred_masks, max_target_sizes, orig_target_sizes):
    mts = np.asarray(max_target_sizes)
    ots = np.asarray(orig_target_sizes)
    p = np.asarray(pred_masks, dtype=np.float64)[:, :, 0]            # (B, Q, H, W)
    B, Q, H, W = p.shape
    max_h, max_w = int(mts[:, 0].max()), int(mts[:, 1].max())
    rh = _bilinear_matrix_np(H, max_h).astype(np.float64)
    rw = _bilinear_matrix_np(W, max_w).astype(np.float64)
    up = np.einsum('oh,bqhw,pw->bqop', rh, p, rw)                    # (B,Q,max_h,max_w)
    outs = []
    for i in range(B):
        img_h, img_w = int(mts[i, 0]), int(mts[i, 1])
        oh, ow = int(ots[i, 0]), int(ots[i, 1])
        sh = _nearest_src_np(img_h, oh)
        sw = _nearest_src_np(img_w, ow)
        outs.append(up[i][:, sh][:, :, sw])                          # (Q, oh, ow)
    return outs


if __name__ == "__main__":
    key = jax.random.PRNGKey(0)
    B, Q, H, W = 2, 4, 16, 16
    pred_masks = jax.random.normal(key, (B, Q, 1, H, W), dtype=jnp.float32)
    outputs = {'pred_masks': pred_masks}

    # per-image padded sizes and original sizes (host-side ints, as in PyTorch)
    max_target_sizes = np.array([[24, 32], [20, 28]], dtype=np.int32)
    orig_target_sizes = np.array([[48, 64], [40, 56]], dtype=np.int32)

    results = [dict() for _ in range(B)]
    postproc = PostProcessSegm(threshold=0.5)
    results = postproc(results, outputs, orig_target_sizes, max_target_sizes)

    ref = _reference_logits(pred_masks, max_target_sizes, orig_target_sizes)
    # bf16 MXU inputs: only pixels whose logit is farther from the decision
    # boundary than the bf16 error bound must match exactly.
    tol = max(1e-3, float(np.abs(np.asarray(pred_masks)).max()) * 2.0 ** -6)
    for i, r in enumerate(results):
        m = jax.block_until_ready(r['masks'])
        oh, ow = int(orig_target_sizes[i, 0]), int(orig_target_sizes[i, 1])
        assert m.dtype == jnp.uint8
        assert m.shape == (Q, 1, oh, ow)
        got = np.asarray(m)[:, 0].astype(np.int64)
        want = (1.0 / (1.0 + np.exp(-ref[i])) > 0.5).astype(np.int64)
        ok = (got == want) | (np.abs(ref[i]) < tol)
        assert bool(ok.all()), f"mask mismatch for image {i}"
        assert 0 <= int(got.min()) and int(got.max()) <= 1
    print("KERNEL_OK")
</pallas_src>

<mosaic_0001>
module attributes {stable_mosaic.version = 11 : i64} {
  func.func @kernel(%arg0: i32, %arg1: i32, %arg2: memref<1x4x16x16xbf16, #tpu.memory_space<vmem>>, %arg3: memref<1x64x16xbf16, #tpu.memory_space<vmem>>, %arg4: memref<1x16x128xbf16, #tpu.memory_space<vmem>>, %arg5: memref<1x4x64x128xi8, #tpu.memory_space<vmem>>) attributes {dimension_semantics = [#tpu.dimension_semantics<parallel>, #tpu.dimension_semantics<parallel>], iteration_bounds = array<i64: 2, 1>, scalar_prefetch = 0 : i64, scratch_operands = 0 : i64, tpu.core_type = #tpu.core_type<tc>, window_params = [{transform_indices = @transform_0, window_bounds = array<i64: 1, 4, 16, 16>}, {transform_indices = @transform_1, window_bounds = array<i64: 1, 64, 16>}, {transform_indices = @transform_2, window_bounds = array<i64: 1, 16, 128>}, {transform_indices = @transform_3, window_bounds = array<i64: 1, 4, 64, 128>}]} {
    %c0 = arith.constant 0 : index
    %c0_0 = arith.constant 0 : index
    %c0_1 = arith.constant 0 : index
    %0 = vector.load %arg3[%c0, %c0_0, %c0_1] : memref<1x64x16xbf16, #tpu.memory_space<vmem>>, vector<1x64x16xbf16>
    %1 = vector.shape_cast %0 : vector<1x64x16xbf16> to vector<64x16xbf16>
    %c0_i32 = arith.constant 0 : i32
    %c0_2 = arith.constant 0 : index
    %2 = arith.index_cast %c0_i32 : i32 to index
    %c0_3 = arith.constant 0 : index
    %c0_4 = arith.constant 0 : index
    %3 = vector.load %arg2[%c0_2, %2, %c0_3, %c0_4] : memref<1x4x16x16xbf16, #tpu.memory_space<vmem>>, vector<1x1x16x16xbf16>
    %4 = vector.shape_cast %3 : vector<1x1x16x16xbf16> to vector<16x16xbf16>
    %cst = arith.constant dense<0.000000e+00> : vector<64x16xf32>
    %5 = tpu.matmul %1, %4, %cst {dimension_numbers = #tpu.dot_dimension_numbers<[1], [0], [0], [1], [0, 0, 1, 1], [], []>} : vector<64x16xbf16>, vector<16x16xbf16>, vector<64x16xf32> -> vector<64x16xf32>
    %6 = arith.truncf %5 : vector<64x16xf32> to vector<64x16xbf16>
    %c0_i32_5 = arith.constant 0 : i32
    %c128_i32 = arith.constant 128 : i32
    %7 = arith.muli %c0_i32_5, %c128_i32 : i32
    %8 = tpu.assume_multiple %7, 128 : i32
    %c0_6 = arith.constant 0 : index
    %c0_7 = arith.constant 0 : index
    %9 = arith.index_cast %8 : i32 to index
    %10 = vector.load %arg4[%c0_6, %c0_7, %9] : memref<1x16x128xbf16, #tpu.memory_space<vmem>>, vector<1x16x128xbf16>
    %11 = vector.shape_cast %10 : vector<1x16x128xbf16> to vector<16x128xbf16>
    %cst_8 = arith.constant dense<0.000000e+00> : vector<64x128xf32>
    %12 = tpu.matmul %6, %11, %cst_8 {dimension_numbers = #tpu.dot_dimension_numbers<[1], [0], [0], [1], [0, 0, 1, 1], [], []>} : vector<64x16xbf16>, vector<16x128xbf16>, vector<64x128xf32> -> vector<64x128xf32>
    %cst_9 = arith.constant 0.000000e+00 : f32
    %13 = vector.broadcast %cst_9 : f32 to vector<64x128xf32>
    %14 = arith.cmpf ogt, %12, %13 : vector<64x128xf32>
    %15 = arith.extui %14 : vector<64x128xi1> to vector<64x128xi8>
    %c0_10 = arith.constant 0 : index
    %16 = arith.index_cast %c0_i32 : i32 to index
    %c0_11 = arith.constant 0 : index
    %17 = arith.index_cast %8 : i32 to index
    %18 = vector.load %arg5[%c0_10, %16, %c0_11, %17] : memref<1x4x64x128xi8, #tpu.memory_space<vmem>>, vector<1x1x64x128xi8>
    %19 = vector.shape_cast %18 : vector<1x1x64x128xi8> to vector<64x128xi8>
    %20 = vector.shape_cast %15 : vector<64x128xi8> to vector<1x1x64x128xi8>
    tpu.vector_store %arg5[%c0_10, %16, %c0_11, %17], %20 {strides = array<i32>} : memref<1x4x64x128xi8, #tpu.memory_space<vmem>>, vector<1x1x64x128xi8>,
    %c1_i32 = arith.constant 1 : i32
    %c1_i32_12 = arith.constant 1 : i32
    %c0_13 = arith.constant 0 : index
    %21 = arith.index_cast %c1_i32_12 : i32 to index
    %c0_14 = arith.constant 0 : index
    %c0_15 = arith.constant 0 : index
    %22 = vector.load %arg2[%c0_13, %21, %c0_14, %c0_15] : memref<1x4x16x16xbf16, #tpu.memory_space<vmem>>, vector<1x1x16x16xbf16>
    %23 = vector.shape_cast %22 : vector<1x1x16x16xbf16> to vector<16x16xbf16>
    %cst_16 = arith.constant dense<0.000000e+00> : vector<64x16xf32>
    %24 = tpu.matmul %1, %23, %cst_16 {dimension_numbers = #tpu.dot_dimension_numbers<[1], [0], [0], [1], [0, 0, 1, 1], [], []>} : vector<64x16xbf16>, vector<16x16xbf16>, vector<64x16xf32> -> vector<64x16xf32>
    %25 = arith.truncf %24 : vector<64x16xf32> to vector<64x16xbf16>
    %c0_i32_17 = arith.constant 0 : i32
    %c128_i32_18 = arith.constant 128 : i32
    %26 = arith.muli %c0_i32_17, %c128_i32_18 : i32
    %27 = tpu.assume_multiple %26, 128 : i32
    %c0_19 = arith.constant 0 : index
    %c0_20 = arith.constant 0 : index
    %28 = arith.index_cast %27 : i32 to index
    %29 = vector.load %arg4[%c0_19, %c0_20, %28] : memref<1x16x128xbf16, #tpu.memory_space<vmem>>, vector<1x16x128xbf16>
    %30 = vector.shape_cast %29 : vector<1x16x128xbf16> to vector<16x128xbf16>
    %cst_21 = arith.constant dense<0.000000e+00> : vector<64x128xf32>
    %31 = tpu.matmul %25, %30, %cst_21 {dimension_numbers = #tpu.dot_dimension_numbers<[1], [0], [0], [1], [0, 0, 1, 1], [], []>} : vector<64x16xbf16>, vector<16x128xbf16>, vector<64x128xf32> -> vector<64x128xf32>
    %cst_22 = arith.constant 0.000000e+00 : f32
    %32 = vector.broadcast %cst_22 : f32 to vector<64x128xf32>
    %33 = arith.cmpf ogt, %31, %32 : vector<64x128xf32>
    %34 = arith.extui %33 : vector<64x128xi1> to vector<64x128xi8>
    %c0_23 = arith.constant 0 : index
    %35 = arith.index_cast %c1_i32_12 : i32 to index
    %c0_24 = arith.constant 0 : index
    %36 = arith.index_cast %27 : i32 to index
    %37 = vector.load %arg5[%c0_23, %35, %c0_24, %36] : memref<1x4x64x128xi8, #tpu.memory_space<vmem>>, vector<1x1x64x128xi8>
    %38 = vector.shape_cast %37 : vector<1x1x64x128xi8> to vector<64x128xi8>
    %39 = vector.shape_cast %34 : vector<64x128xi8> to vector<1x1x64x128xi8>
    tpu.vector_store %arg5[%c0_23, %35, %c0_24, %36], %39 {strides = array<i32>} : memref<1x4x64x128xi8, #tpu.memory_space<vmem>>, vector<1x1x64x128xi8>,
    %c1_i32_25 = arith.constant 1 : i32
    %c2_i32 = arith.constant 2 : i32
    %c0_26 = arith.constant 0 : index
    %40 = arith.index_cast %c2_i32 : i32 to index
    %c0_27 = arith.constant 0 : index
    %c0_28 = arith.constant 0 : index
    %41 = vector.load %arg2[%c0_26, %40, %c0_27, %c0_28] : memref<1x4x16x16xbf16, #tpu.memory_space<vmem>>, vector<1x1x16x16xbf16>
    %42 = vector.shape_cast %41 : vector<1x1x16x16xbf16> to vector<16x16xbf16>
    %cst_29 = arith.constant dense<0.000000e+00> : vector<64x16xf32>
    %43 = tpu.matmul %1, %42, %cst_29 {dimension_numbers = #tpu.dot_dimension_numbers<[1], [0], [0], [1], [0, 0, 1, 1], [], []>} : vector<64x16xbf16>, vector<16x16xbf16>, vector<64x16xf32> -> vector<64x16xf32>
    %44 = arith.truncf %43 : vector<64x16xf32> to vector<64x16xbf16>
    %c0_i32_30 = arith.constant 0 : i32
    %c128_i32_31 = arith.constant 128 : i32
    %45 = arith.muli %c0_i32_30, %c128_i32_31 : i32
    %46 = tpu.assume_multiple %45, 128 : i32
    %c0_32 = arith.constant 0 : index
    %c0_33 = arith.constant 0 : index
    %47 = arith.index_cast %46 : i32 to index
    %48 = vector.load %arg4[%c0_32, %c0_33, %47] : memref<1x16x128xbf16, #tpu.memory_space<vmem>>, vector<1x16x128xbf16>
    %49 = vector.shape_cast %48 : vector<1x16x128xbf16> to vector<16x128xbf16>
    %cst_34 = arith.constant dense<0.000000e+00> : vector<64x128xf32>
    %50 = tpu.matmul %44, %49, %cst_34 {dimension_numbers = #tpu.dot_dimension_numbers<[1], [0], [0], [1], [0, 0, 1, 1], [], []>} : vector<64x16xbf16>, vector<16x128xbf16>, vector<64x128xf32> -> vector<64x128xf32>
    %cst_35 = arith.constant 0.000000e+00 : f32
    %51 = vector.broadcast %cst_35 : f32 to vector<64x128xf32>
    %52 = arith.cmpf ogt, %50, %51 : vector<64x128xf32>
    %53 = arith.extui %52 : vector<64x128xi1> to vector<64x128xi8>
    %c0_36 = arith.constant 0 : index
    %54 = arith.index_cast %c2_i32 : i32 to index
    %c0_37 = arith.constant 0 : index
    %55 = arith.index_cast %46 : i32 to index
    %56 = vector.load %arg5[%c0_36, %54, %c0_37, %55] : memref<1x4x64x128xi8, #tpu.memory_space<vmem>>, vector<1x1x64x128xi8>
    %57 = vector.shape_cast %56 : vector<1x1x64x128xi8> to vector<64x128xi8>
    %58 = vector.shape_cast %53 : vector<64x128xi8> to vector<1x1x64x128xi8>
    tpu.vector_store %arg5[%c0_36, %54, %c0_37, %55], %58 {strides = array<i32>} : memref<1x4x64x128xi8, #tpu.memory_space<vmem>>, vector<1x1x64x128xi8>,
    %c1_i32_38 = arith.constant 1 : i32
    %c3_i32 = arith.constant 3 : i32
    %c0_39 = arith.constant 0 : index
    %59 = arith.index_cast %c3_i32 : i32 to index
    %c0_40 = arith.constant 0 : index
    %c0_41 = arith.constant 0 : index
    %60 = vector.load %arg2[%c0_39, %59, %c0_40, %c0_41] : memref<1x4x16x16xbf16, #tpu.memory_space<vmem>>, vector<1x1x16x16xbf16>
    %61 = vector.shape_cast %60 : vector<1x1x16x16xbf16> to vector<16x16xbf16>
    %cst_42 = arith.constant dense<0.000000e+00> : vector<64x16xf32>
    %62 = tpu.matmul %1, %61, %cst_42 {dimension_numbers = #tpu.dot_dimension_numbers<[1], [0], [0], [1], [0, 0, 1, 1], [], []>} : vector<64x16xbf16>, vector<16x16xbf16>, vector<64x16xf32> -> vector<64x16xf32>
    %63 = arith.truncf %62 : vector<64x16xf32> to vector<64x16xbf16>
    %c0_i32_43 = arith.constant 0 : i32
    %c128_i32_44 = arith.constant 128 : i32
    %64 = arith.muli %c0_i32_43, %c128_i32_44 : i32
    %65 = tpu.assume_multiple %64, 128 : i32
    %c0_45 = arith.constant 0 : index
    %c0_46 = arith.constant 0 : index
    %66 = arith.index_cast %65 : i32 to index
    %67 = vector.load %arg4[%c0_45, %c0_46, %66] : memref<1x16x128xbf16, #tpu.memory_space<vmem>>, vector<1x16x128xbf16>
    %68 = vector.shape_cast %67 : vector<1x16x128xbf16> to vector<16x128xbf16>
    %cst_47 = arith.constant dense<0.000000e+00> : vector<64x128xf32>
    %69 = tpu.matmul %63, %68, %cst_47 {dimension_numbers = #tpu.dot_dimension_numbers<[1], [0], [0], [1], [0, 0, 1, 1], [], []>} : vector<64x16xbf16>, vector<16x128xbf16>, vector<64x128xf32> -> vector<64x128xf32>
    %cst_48 = arith.constant 0.000000e+00 : f32
    %70 = vector.broadcast %cst_48 : f32 to vector<64x128xf32>
    %71 = arith.cmpf ogt, %69, %70 : vector<64x128xf32>
    %72 = arith.extui %71 : vector<64x128xi1> to vector<64x128xi8>
    %c0_49 = arith.constant 0 : index
    %73 = arith.index_cast %c3_i32 : i32 to index
    %c0_50 = arith.constant 0 : index
    %74 = arith.index_cast %65 : i32 to index
    %75 = vector.load %arg5[%c0_49, %73, %c0_50, %74] : memref<1x4x64x128xi8, #tpu.memory_space<vmem>>, vector<1x1x64x128xi8>
    %76 = vector.shape_cast %75 : vector<1x1x64x128xi8> to vector<64x128xi8>
    %77 = vector.shape_cast %72 : vector<64x128xi8> to vector<1x1x64x128xi8>
    tpu.vector_store %arg5[%c0_49, %73, %c0_50, %74], %77 {strides = array<i32>} : memref<1x4x64x128xi8, #tpu.memory_space<vmem>>, vector<1x1x64x128xi8>,
    %c1_i32_51 = arith.constant 1 : i32
    %c4_i32 = arith.constant 4 : i32
    return
  }
  func.func @transform_0(%arg0: i32, %arg1: i32) -> (i32, i32, i32, i32) {
    %c0_i32 = arith.constant 0 : i32
    %c0_i32_0 = arith.constant 0 : i32
    %c0_i32_1 = arith.constant 0 : i32
    return %arg0, %arg1, %c0_i32, %c0_i32_0 : i32, i32, i32, i32
  }
  func.func @transform_1(%arg0: i32, %arg1: i32) -> (i32, i32, i32) {
    %c0_i32 = arith.constant 0 : i32
    %c0_i32_0 = arith.constant 0 : i32
    %c0_i32_1 = arith.constant 0 : i32
    return %arg0, %c0_i32, %c0_i32_0 : i32, i32, i32
  }
  func.func @transform_2(%arg0: i32, %arg1: i32) -> (i32, i32, i32) {
    %c0_i32 = arith.constant 0 : i32
    %c0_i32_0 = arith.constant 0 : i32
    %c0_i32_1 = arith.constant 0 : i32
    return %arg0, %c0_i32, %c0_i32_0 : i32, i32, i32
  }
  func.func @transform_3(%arg0: i32, %arg1: i32) -> (i32, i32, i32, i32) {
    %c0_i32 = arith.constant 0 : i32
    %c0_i32_0 = arith.constant 0 : i32
    %c0_i32_1 = arith.constant 0 : i32
    return %arg0, %arg1, %c0_i32, %c0_i32_0 : i32, i32, i32, i32
  }
}

</mosaic_0001>

<bundles_post_ra>
// kernel: tpu_custom_call.1
= control target key start
LH: loop header
LB: loop body
LE: loop exit
PB: predicated region body
PF: predicated region fallthrough
CT: control target
= control target key end

     0   :  { %8 = vsyncpa [#allocation3], 0  ;;  %s1699_s0 = inlined_call_operand.vmem [shape: bf16[2,4,16,16], index: 0, kind: input, shape index: {}]   ;;  %s1700_s1 = inlined_call_operand.vmem [shape: bf16[2,64,16], index: 1, kind: input, shape index: {}]   ;;  %s1701_s2 = inlined_call_operand.vmem [shape: bf16[2,16,128], index: 2, kind: input, shape index: {}]   ;;  %s1702_s3 = inlined_call_operand.hbm [shape: u8[2,4,64,128], index: 3, kind: output, shape index: {}]  }
   0x1   :  { %10 = vsyncpa [#allocation3 + $0x1], 0  ;;  %s1514_s12 = smov 0   ;;  %s1516_s13 = smov 0  }
   0x2   :  { %s1518_s14 = smov 0   ;;  %s1520_s15 = smov 0  }
   0x3   :  { %s1522_s16 = smov 0   ;;  %s1524_s17 = smov 0  }
   0x4 LB: > { %s1145_s18 = sadd.s32 4294967295, %s1488_s17   ;;  %s1146_s19 = sadd.s32 4294967294, %s1488_s17   ;;  %s1488_s17 = sphi %s1524_s17, %s16_s17   ;;  %s1484_s16 = sphi %s1522_s16, %s1709_s16   ;;  %s1480_s15 = sphi %s1520_s15, %s1708_s15   ;;  %s1476_s14 = sphi %s1518_s14, %s1707_s14   ;;  %s1472_s13 = sphi %s1516_s13, %s1706_s13   ;;  %s1468_s12 = sphi %s1514_s12, %s1705_s12  }
   0x5   : > { %s28_s20 = sadd.s32 1, %s1484_s16  ;;  %s117_s21 = sadd.s32 1, %s1476_s14 }
   0x6   : > { %p30_p0 = scmp.ge.s32.totalorder %s28_s20, 2  ;;  %p127_p1 = scmp.ne.s32.totalorder %s1476_s14, %s1472_s13 }
   0x7   : > { %p128_p2 = scmp.eq.s32.totalorder %s1145_s18, 1  ;;  %p133_p3 = scmp.ne.s32.totalorder %s1472_s13, %s1468_s12 }
   0x8   : > { %s1711_s20 = smov (%p30_p0, %s28_s20), 0  ;;  %p134_p5 = scmp.eq.s32.totalorder %s1146_s19, 1 }
   0x9   : > { %p1554_p4 = por %p128_p2, %p127_p1  ;;  %s112_s23 = ssub.s32 %s1484_s16, %s1711_s20 }
   0xa   : > { %p1149_p6 = scmp.ge.s32.totalorder %s1488_s17, 1  ;;  %p115_p7 = scmp.eq.s32.totalorder %s112_s23, 0 }
   0xb   : > { %p1561_p8 = por %p134_p5, %p133_p3  ;;  %p182_p9 = scmp.lt.s32.totalorder %s1488_s17, 3 }
   0xc   : > { %s1567_s25 = scalar_select %p115_p7, %s1476_s14, %s117_s21  }
   0xd   : > { %p183_p10 = pnand %p1149_p6, %p182_p9 }
   0xe   : > { %p222_p11 = scmp.lt.s32.totalorder (!%p183_p10), %s1480_s15, 1  ;;  %s218_s11 = sand.u32 (!%p183_p10), 1, %s1472_s13  }
   0xf   : > { %186 = sbr.rel (%p183_p10) target bundleno = 504 (0x1f8), region = 32  ;;  %s1150_s18 = sshll.u32 (!%p183_p10), %s218_s11, 6 }
  0x10   : > { %s1626_s19 = scalar_lea.vmem (!%p183_p10), [#allocation2], %s1150_s18  ;;  %s1221_s21 = sshll.u32 (!%p183_p10), %s1480_s15, 10 }
  0x11   : > { %s1036_s23 = sshll.u32 (!%p183_p10), %s1626_s19, 4  ;;  %s1646_s28 = scalar_lea.hbm (!%p183_p10), %s1702_s3, %s1221_s21  ;;  %s1648_s23 = int_to_ptr.vmem [resolvable:$true] %s1036_s23 }
  0x12   : > { %s1412_s29 = scalar_lea.vmem (!%p183_p10), %s1648_s23, 1024 }
  0x13   : > { %p1413_p12 = scmp.ne.s32.totalorder (!%p183_p10), %s1648_s23, %s1412_s29 }
  0x14   : > { %s1571_s26 = scalar_select %p222_p11, %s1480_s15, 1  ;;  %vm282_vm0 = vcmask 130048  }
  0x15   : > { %s1654_s15 = scalar_lea.sflag [#allocation3], %s218_s11  ;;  %p1414_p13 = pnand %p1413_p12, %p1554_p4 }
  0x16   : > { %s1218_s27 = sshll.u32 %s1571_s26, 5  ;;  %s1220_s7 = sshll.u32 %s1571_s26, 3 }
  0x17   : > { %s230_s30 = scalar_lea.vmem %s1699_s0, %s1218_s27  ;;  %s236_s6 = scalar_lea.vmem %s1700_s1, %s1218_s27 }
  0x18   : > { %v1400_v0 = vld [vmem:[%s230_s30] sm:$0xff]   ;;  %v1402_v2 = vld [vmem:[%s236_s6 + $0x8] sm:$0xff]   ;;  %v1404_v4 = vld [vmem:[%s236_s6 + $0x10] sm:$0xff]   ;;  %s1600_s10 = scalar_lea.vmem %s1701_s2, %s1220_s7  ;;  %p1415_p0 = pneg %p1414_p13 }
  0x19   : > { %v1401_v1 = vld [vmem:[%s236_s6] sm:$0xff]   ;;  %1262 = vmatprep.subr.bf16.mxu0 %v1400_v0  ;;  %v1403_v3 = vld [vmem:[%s230_s30 + $0x8] sm:$0xff]   ;;  %v1406_v5 = vld [vmem:[%s230_s30 + $0x10] sm:$0xff]  }
  0x1a   : > { %1263 = vmatpush3.bf16.msra.mxu0 %v1400_v0  ;;  %1264 = vmatprep.mubr.msk.bf16.mxu0 %vm282_vm0, %v1401_v1  ;;  %v1405_v6 = vld [vmem:[%s236_s6 + $0x18] sm:$0xff]   ;;  %v1408_v8 = vld [vmem:[%s1600_s10] sm:$0xff]  }
  0x1b   : > { %1282 = vmatprep.subr.bf16.mxu0 %v1403_v3  ;;  %v1407_v7 = vld [vmem:[%s230_s30 + $0x18] sm:$0xff]   ;;  %1272 = vmatprep.subr.bf16.mxu1 %v1408_v8  ;;  %v1409_v9 = vld [vmem:[%s1600_s10] sm:$0xff]   ;;  %s1491_s30 = smov [#allocation2]  }
  0x1c   : > { %1273 = vmatpush3.bf16.msra.mxu1 %v1408_v8  ;;  %v1410_v17 = vld [vmem:[%s1600_s10] sm:$0xff]   ;;  %s1416_s4 = sshll.u32 %s1491_s30, 4  ;;  %s1417_s4 = int_to_ptr.vmem [resolvable:$false] %s1416_s4 }
  0x1d   : > { %1265 = vmatmul.mubr.msk.bf16.vlgmr.msra.gmra.mxu0 %vm282_vm0, %v1402_v2  ;;  %1292 = vmatprep.subr.bf16.mxu1 %v1409_v9  ;;  %v1411_v30 = vld [vmem:[%s1600_s10] sm:$0xff]   ;;  %s1418_s5 = scalar_lea.vmem %s1417_s4, 2048  ;;  %p1419_p1 = scmp.lt.s32.totalorder %s1648_s23, %s1417_s4 }
  0x1e   : > { %1283 = vmatpush3.bf16.msra.mxu0 %v1403_v3  ;;  %1268 = vmatprep.mubr.msk.bf16.mxu0 %vm282_vm0, %v1404_v4  ;;  %p1420_p2 = scmp.lt.s32.totalorder %s1418_s5, %s1412_s29 }
  0x1f   : > { %1302 = vmatprep.subr.bf16.mxu0 %v1406_v5 }
  0x20   : > { %p1421_p3 = por %p1420_p2, %p1419_p1 }
  0x22   : > { %p1422_p5 = pnand %p1421_p3, %p1415_p0 }
  0x25   : > { %1269 = vmatmul.mubr.msk.bf16.gmra.mxu0 %vm282_vm0, %v1405_v6 }
  0x26   : > { %1284 = vmatprep.mubr.msk.bf16.mxu0 %vm282_vm0, %v1401_v1 }
  0x2d   : > { %1285 = vmatmul.mubr.msk.bf16.vlgmr.msra.gmra.mxu0 %vm282_vm0, %v1402_v2 }
  0x2e   : > { %1303 = vmatpush3.bf16.msra.mxu0 %v1406_v5  ;;  %1288 = vmatprep.mubr.msk.bf16.mxu0 %vm282_vm0, %v1404_v4 }
  0x2f   : > { %1322 = vmatprep.subr.bf16.mxu0 %v1407_v7 }
  0x35   : > { %1289 = vmatmul.mubr.msk.bf16.gmra.mxu0 %vm282_vm0, %v1405_v6 }
  0x36   : > { %1304 = vmatprep.mubr.msk.bf16.mxu0 %vm282_vm0, %v1401_v1 }
  0x3d   : > { %1305 = vmatmul.mubr.msk.bf16.vlgmr.msra.gmra.mxu0 %vm282_vm0, %v1402_v2 }
  0x3e   : > { %1323 = vmatpush3.bf16.msra.mxu0 %v1407_v7  ;;  %1308 = vmatprep.mubr.msk.bf16.mxu0 %vm282_vm0, %v1404_v4 }
  0x45   : > { %1309 = vmatmul.mubr.msk.bf16.gmra.mxu0 %vm282_vm0, %v1405_v6 }
  0x46   : > { %1324 = vmatprep.mubr.msk.bf16.mxu0 %vm282_vm0, %v1401_v1  ;;  %v1490_v1 = vmov 0  }
  0x4d   : > { %1325 = vmatmul.mubr.msk.bf16.vlgmr.msra.gmra.mxu0 %vm282_vm0, %v1402_v2 }
  0x4e   : > { %1328 = vmatprep.mubr.msk.bf16.mxu0 %vm282_vm0, %v1404_v4 }
  0x55   : > { %1329 = vmatmul.mubr.msk.bf16.gmra.mxu0 %vm282_vm0, %v1405_v6 }
  0xdd   : > { %v1266_v10 = vpop.f32.mrf.mxu0 }
  0xdf   : > { %v329_v11 = vpop.f32.mrf.mxu0 }
  0xe1   : > { %v1267_v12 = vpop.f32.mrf.mxu0 }
  0xe2   : > { %v361_v15 = vpack.c.bf16 %v1267_v12, %v1266_v10 }
  0xe3   : > { %v332_v13 = vpop.f32.mrf.mxu0 }
  0xe4   : > { %v360_v14 = vpack.c.bf16 %v332_v13, %v329_v11 }
  0xe5   : > { %v1270_v16 = vpop.f32.mrf.mxu0 }
  0xe6   : > { %1274 = vmatprep.mubr.msk.bf16.mxu1 %vm282_vm0, %v360_v14 }
  0xe7   : > { %v345_v18 = vpop.f32.mrf.mxu0  ;;  %1275 = vmatmul.mubr.msk.bf16.vlgmr.msra.gmra.mxu1 %vm282_vm0, %v361_v15 }
  0xe8   : > { %1293 = vmatpush3.bf16.msra.mxu1 %v1409_v9 }
  0xe9   : > { %v1271_v19 = vpop.f32.mrf.mxu0  ;;  %1312 = vmatprep.subr.bf16.mxu1 %v1410_v17 }
  0xea   : > { %v363_v22 = vpack.c.bf16 %v1271_v19, %v1270_v16 }
  0xeb   : > { %v348_v20 = vpop.f32.mrf.mxu0 }
  0xec   : > { %v362_v21 = vpack.c.bf16 %v348_v20, %v345_v18 }
  0xed   : > { %v1286_v23 = vpop.f32.mrf.mxu0 }
  0xee   : > { %1278 = vmatprep.mubr.msk.bf16.mxu1 %vm282_vm0, %v362_v21 }
  0xef   : > { %1279 = vmatmul.mubr.msk.bf16.gmra.mxu1 %vm282_vm0, %v363_v22  ;;  %v510_v24 = vpop.f32.mrf.mxu0 }
  0xf1   : > { %v1287_v25 = vpop.f32.mrf.mxu0 }
  0xf2   : > { %v542_v28 = vpack.c.bf16 %v1287_v25, %v1286_v23 }
  0xf3   : > { %v513_v26 = vpop.f32.mrf.mxu0 }
  0xf4   : > { %v541_v27 = vpack.c.bf16 %v513_v26, %v510_v24 }
  0xf5   : > { %v1290_v29 = vpop.f32.mrf.mxu0 }
  0xf6   : > { %1294 = vmatprep.mubr.msk.bf16.mxu1 %vm282_vm0, %v541_v27 }
  0xf7   : > { %v526_v31 = vpop.f32.mrf.mxu0  ;;  %1295 = vmatmul.mubr.msk.bf16.vlgmr.msra.gmra.mxu1 %vm282_vm0, %v542_v28 }
  0xf8   : > { %1313 = vmatpush3.bf16.msra.mxu1 %v1410_v17 }
  0xf9   : > { %v1291_v32 = vpop.f32.mrf.mxu0  ;;  %1332 = vmatprep.subr.bf16.mxu1 %v1411_v30 }
  0xfa   : > { %v544_v35 = vpack.c.bf16 %v1291_v32, %v1290_v29 }
  0xfb   : > { %v529_v33 = vpop.f32.mrf.mxu0 }
  0xfc   : > { %v543_v34 = vpack.c.bf16 %v529_v33, %v526_v31 }
  0xfd   : > { %v1306_v36 = vpop.f32.mrf.mxu0 }
  0xfe   : > { %1298 = vmatprep.mubr.msk.bf16.mxu1 %vm282_vm0, %v543_v34 }
  0xff   : > { %1299 = vmatmul.mubr.msk.bf16.gmra.mxu1 %vm282_vm0, %v544_v35  ;;  %v694_v37 = vpop.f32.mrf.mxu0 }
 0x101   : > { %v1307_v38 = vpop.f32.mrf.mxu0 }
 0x102   : > { %v726_v41 = vpack.c.bf16 %v1307_v38, %v1306_v36 }
 0x103   : > { %v697_v39 = vpop.f32.mrf.mxu0 }
 0x104   : > { %v725_v40 = vpack.c.bf16 %v697_v39, %v694_v37 }
 0x105   : > { %v1310_v42 = vpop.f32.mrf.mxu0 }
 0x106   : > { %1314 = vmatprep.mubr.msk.bf16.mxu1 %vm282_vm0, %v725_v40 }
 0x107   : > { %v710_v43 = vpop.f32.mrf.mxu0  ;;  %1315 = vmatmul.mubr.msk.bf16.vlgmr.msra.gmra.mxu1 %vm282_vm0, %v726_v41 }
 0x108   : > { %1333 = vmatpush3.bf16.msra.mxu1 %v1411_v30 }
 0x109   : > { %v1311_v44 = vpop.f32.mrf.mxu0 }
 0x10a   : > { %v728_v47 = vpack.c.bf16 %v1311_v44, %v1310_v42 }
 0x10b   : > { %v713_v45 = vpop.f32.mrf.mxu0 }
 0x10c   : > { %v727_v46 = vpack.c.bf16 %v713_v45, %v710_v43 }
 0x10d   : > { %v1326_v48 = vpop.f32.mrf.mxu0 }
 0x10e   : > { %1318 = vmatprep.mubr.msk.bf16.mxu1 %vm282_vm0, %v727_v46 }
 0x10f   : > { %1319 = vmatmul.mubr.msk.bf16.gmra.mxu1 %vm282_vm0, %v728_v47  ;;  %v878_v49 = vpop.f32.mrf.mxu0 }
 0x111   : > { %v1327_v50 = vpop.f32.mrf.mxu0 }
 0x112   : > { %v910_v53 = vpack.c.bf16 %v1327_v50, %v1326_v48 }
 0x113   : > { %v881_v51 = vpop.f32.mrf.mxu0 }
 0x114   : > { %v909_v52 = vpack.c.bf16 %v881_v51, %v878_v49 }
 0x115   : > { %v1330_v54 = vpop.f32.mrf.mxu0 }
 0x116   : > { %1334 = vmatprep.mubr.msk.bf16.mxu1 %vm282_vm0, %v909_v52 }
 0x117   : > { %v894_v55 = vpop.f32.mrf.mxu0  ;;  %1335 = vmatmul.mubr.msk.bf16.vlgmr.msra.gmra.mxu1 %vm282_vm0, %v910_v53 }
 0x119   : > { %v1331_v56 = vpop.f32.mrf.mxu0 }
 0x11a   : > { %v912_v59 = vpack.c.bf16 %v1331_v56, %v1330_v54 }
 0x11b   : > { %v897_v57 = vpop.f32.mrf.mxu0 }
 0x11c   : > { %v911_v58 = vpack.c.bf16 %v897_v57, %v894_v55 }
 0x11e   : > { %1338 = vmatprep.mubr.msk.bf16.mxu1 %vm282_vm0, %v911_v58 }
 0x11f   : > { %1339 = vmatmul.mubr.msk.bf16.gmra.mxu1 %vm282_vm0, %v912_v59 }
 0x1a7   : > { %v1276_v60 = vpop.f32.mrf.mxu1 }
 0x1a8   : > { %vm451_vm2 = vcmp.gt.f32.partialorder %v1276_v60, 0.0 }
 0x1a9   : > { %v418_v61 = vpop.f32.mrf.mxu1 }
 0x1aa   : > { %vm449_vm3 = vcmp.gt.f32.partialorder %v418_v61, 0.0 }
 0x1ab   : > { %v1277_v62 = vpop.f32.mrf.mxu1 }
 0x1ac   : > { %vm452_vm1 = vcmp.gt.f32.partialorder %v1277_v62, 0.0 }
 0x1ad   : > { %v421_v63 = vpop.f32.mrf.mxu1  ;;  %vm458_vm4 = vmpackc.low %vm452_vm1, %vm451_vm2 }
 0x1ae   : > { %vm450_vm5 = vcmp.gt.f32.partialorder %v421_v63, 0.0 }
 0x1af   : > { %vm457_vm6 = vmpackc.low %vm450_vm5, %vm449_vm3  ;;  %v1280_v0 = vpop.f32.mrf.mxu1 }
 0x1b0   : > { %vm459_vm7 = vmpackc.even %vm458_vm4, %vm457_vm6  ;;  %vm455_vm9 = vcmp.gt.f32.partialorder %v1280_v0, 0.0 }
 0x1b1   : > { %v463_v2 = vsel %vm459_vm7, 16843009, %v1490_v1  ;;  %v434_v3 = vpop.f32.mrf.mxu1 }
 0x1b2   : > { %465 = vst [vmem:[%s1626_s19] sm:$0xff] %v463_v2  ;;  %vm453_vm10 = vcmp.gt.f32.partialorder %v434_v3, 0.0 }
 0x1b3   : > { %v1281_v4 = vpop.f32.mrf.mxu1 }
 0x1b4   : > { %vm456_vm8 = vcmp.gt.f32.partialorder %v1281_v4, 0.0 }
 0x1b5   : > { %v437_v5 = vpop.f32.mrf.mxu1  ;;  %vm461_vm11 = vmpackc.low %vm456_vm8, %vm455_vm9 }
 0x1b6   : > { %vm454_vm12 = vcmp.gt.f32.partialorder %v437_v5, 0.0 }
 0x1b7   : > { %vm460_vm13 = vmpackc.low %vm454_vm12, %vm453_vm10  ;;  %v1296_v6 = vpop.f32.mrf.mxu1 }
 0x1b8   : > { %vm462_vm14 = vmpackc.even %vm461_vm11, %vm460_vm13  ;;  %vm632_vm0 = vcmp.gt.f32.partialorder %v1296_v6, 0.0 }
 0x1b9   : > { %v464_v7 = vsel %vm462_vm14, 16843009, %v1490_v1  ;;  %v599_v8 = vpop.f32.mrf.mxu1 }
 0x1ba   : > { %466 = vst [vmem:[%s1626_s19 + $0x8] sm:$0xff] %v464_v7  ;;  %vm630_vm1 = vcmp.gt.f32.partialorder %v599_v8, 0.0 }
 0x1bb   : > { %v1297_v9 = vpop.f32.mrf.mxu1 }
 0x1bc   : > { %vm633_vm15 = vcmp.gt.f32.partialorder %v1297_v9, 0.0 }
 0x1bd   : > { %v602_v10 = vpop.f32.mrf.mxu1  ;;  %vm639_vm2 = vmpackc.low %vm633_vm15, %vm632_vm0 }
 0x1be   : > { %vm631_vm3 = vcmp.gt.f32.partialorder %v602_v10, 0.0 }
 0x1bf   : > { %vm638_vm4 = vmpackc.low %vm631_vm3, %vm630_vm1  ;;  %v1300_v11 = vpop.f32.mrf.mxu1 }
 0x1c0   : > { %vm640_vm5 = vmpackc.even %vm639_vm2, %vm638_vm4  ;;  %vm636_vm7 = vcmp.gt.f32.partialorder %v1300_v11, 0.0 }
 0x1c1   : > { %v644_v12 = vsel %vm640_vm5, 16843009, %v1490_v1  ;;  %v615_v13 = vpop.f32.mrf.mxu1 }
 0x1c2   : > { %1183 = vst [vmem:[%s1626_s19 + $0x10] sm:$0xff] %v644_v12  ;;  %vm634_vm8 = vcmp.gt.f32.partialorder %v615_v13, 0.0 }
 0x1c3   : > { %v1301_v14 = vpop.f32.mrf.mxu1 }
 0x1c4   : > { %vm637_vm6 = vcmp.gt.f32.partialorder %v1301_v14, 0.0 }
 0x1c5   : > { %v618_v15 = vpop.f32.mrf.mxu1  ;;  %vm642_vm9 = vmpackc.low %vm637_vm6, %vm636_vm7 }
 0x1c6   : > { %vm635_vm10 = vcmp.gt.f32.partialorder %v618_v15, 0.0 }
 0x1c7   : > { %vm641_vm11 = vmpackc.low %vm635_vm10, %vm634_vm8  ;;  %v1316_v16 = vpop.f32.mrf.mxu1 }
 0x1c8   : > { %vm643_vm12 = vmpackc.even %vm642_vm9, %vm641_vm11  ;;  %vm816_vm14 = vcmp.gt.f32.partialorder %v1316_v16, 0.0 }
 0x1c9   : > { %v645_v17 = vsel %vm643_vm12, 16843009, %v1490_v1  ;;  %v783_v18 = vpop.f32.mrf.mxu1 }
 0x1ca   : > { %1184 = vst [vmem:[%s1626_s19 + $0x18] sm:$0xff] %v645_v17  ;;  %vm814_vm15 = vcmp.gt.f32.partialorder %v783_v18, 0.0 }
 0x1cb   : > { %v1317_v19 = vpop.f32.mrf.mxu1 }
 0x1cc   : > { %vm817_vm13 = vcmp.gt.f32.partialorder %v1317_v19, 0.0 }
 0x1cd   : > { %v786_v20 = vpop.f32.mrf.mxu1  ;;  %vm823_vm0 = vmpackc.low %vm817_vm13, %vm816_vm14 }
 0x1ce   : > { %vm815_vm1 = vcmp.gt.f32.partialorder %v786_v20, 0.0 }
 0x1cf   : > { %vm822_vm2 = vmpackc.low %vm815_vm1, %vm814_vm15  ;;  %v1320_v21 = vpop.f32.mrf.mxu1 }
 0x1d0   : > { %vm824_vm3 = vmpackc.even %vm823_vm0, %vm822_vm2  ;;  %vm820_vm5 = vcmp.gt.f32.partialorder %v1320_v21, 0.0 }
 0x1d1   : > { %v828_v22 = vsel %vm824_vm3, 16843009, %v1490_v1  ;;  %v799_v23 = vpop.f32.mrf.mxu1 }
 0x1d2   : > { %1197 = vst [vmem:[%s1626_s19 + $0x20] sm:$0xff] %v828_v22  ;;  %vm818_vm6 = vcmp.gt.f32.partialorder %v799_v23, 0.0 }
 0x1d3   : > { %v1321_v24 = vpop.f32.mrf.mxu1 }
 0x1d4   : > { %vm821_vm4 = vcmp.gt.f32.partialorder %v1321_v24, 0.0 }
 0x1d5   : > { %v802_v25 = vpop.f32.mrf.mxu1  ;;  %vm826_vm7 = vmpackc.low %vm821_vm4, %vm820_vm5 }
 0x1d6   : > { %vm819_vm8 = vcmp.gt.f32.partialorder %v802_v25, 0.0 }
 0x1d7   : > { %vm825_vm9 = vmpackc.low %vm819_vm8, %vm818_vm6  ;;  %v1336_v26 = vpop.f32.mrf.mxu1 }
 0x1d8   : > { %vm827_vm10 = vmpackc.even %vm826_vm7, %vm825_vm9  ;;  %vm1000_vm12 = vcmp.gt.f32.partialorder %v1336_v26, 0.0 }
 0x1d9   : > { %v829_v27 = vsel %vm827_vm10, 16843009, %v1490_v1  ;;  %v967_v28 = vpop.f32.mrf.mxu1 }
 0x1da   : > { %1198 = vst [vmem:[%s1626_s19 + $0x28] sm:$0xff] %v829_v27  ;;  %vm998_vm13 = vcmp.gt.f32.partialorder %v967_v28, 0.0 }
 0x1db   : > { %v1337_v29 = vpop.f32.mrf.mxu1 }
 0x1dc   : > { %vm1001_vm11 = vcmp.gt.f32.partialorder %v1337_v29, 0.0 }
 0x1dd   : > { %v970_v30 = vpop.f32.mrf.mxu1  ;;  %vm1007_vm14 = vmpackc.low %vm1001_vm11, %vm1000_vm12 }
 0x1de   : > { %vm999_vm15 = vcmp.gt.f32.partialorder %v970_v30, 0.0 }
 0x1df   : > { %vm1006_vm0 = vmpackc.low %vm999_vm15, %vm998_vm13  ;;  %v1340_v31 = vpop.f32.mrf.mxu1 }
 0x1e0   : > { %vm1008_vm1 = vmpackc.even %vm1007_vm14, %vm1006_vm0  ;;  %vm1004_vm3 = vcmp.gt.f32.partialorder %v1340_v31, 0.0 }
 0x1e1   : > { %v1012_v32 = vsel %vm1008_vm1, 16843009, %v1490_v1  ;;  %v983_v33 = vpop.f32.mrf.mxu1 }
 0x1e2   : > { %1211 = vst [vmem:[%s1626_s19 + $0x30] sm:$0xff] %v1012_v32  ;;  %vm1002_vm4 = vcmp.gt.f32.partialorder %v983_v33, 0.0 }
 0x1e3   : > { %v1341_v34 = vpop.f32.mrf.mxu1 }
 0x1e4   : > { %vm1005_vm2 = vcmp.gt.f32.partialorder %v1341_v34, 0.0 }
 0x1e5   : > { %v986_v35 = vpop.f32.mrf.mxu1  ;;  %vm1010_vm5 = vmpackc.low %vm1005_vm2, %vm1004_vm3 }
 0x1e6   : > { %vm1003_vm6 = vcmp.gt.f32.partialorder %v986_v35, 0.0 }
 0x1e7   : > { %vm1009_vm7 = vmpackc.low %vm1003_vm6, %vm1002_vm4 }
 0x1e8   : > { %vm1011_vm8 = vmpackc.even %vm1010_vm5, %vm1009_vm7 }
 0x1e9   : > { %v1013_v36 = vsel %vm1011_vm8, 16843009, %v1490_v1 }
 0x1ea   : > { %1212 = vst [vmem:[%s1626_s19 + $0x38] sm:$0xff] %v1013_v36 }
 0x1eb   : > { %1425 = shalt.err (!%p1422_p5)
}
 0x1ec   : > { %s1426_s6 = scalar_lea.hbm %s1646_s28, 1024  ;;  %s1430_s9 = scalar_lea.hbm %s1702_s3, 2048 }
 0x1ed   : > { %p1427_p6 = scmp.ne.s32.totalorder %s1646_s28, %s1426_s6  ;;  %p1431_p10 = scmp.lt.s32.totalorder %s1646_s28, %s1702_s3 }
 0x1ee   : > { %p1432_p11 = scmp.lt.s32.totalorder %s1430_s9, %s1426_s6 }
 0x1ef   : > { %p1428_p7 = pnand %p1427_p6, %p1554_p4 }
 0x1f0   : > { %p1433_p12 = por %p1432_p11, %p1431_p10 }
 0x1f1   : > { %p1429_p9 = pneg %p1428_p7 }
 0x1f3   : > { %p1434_p13 = pnand %p1433_p12, %p1429_p9 }
 0x1f5   : > { %1437 = shalt.err (!%p1434_p13)
}
 0x1f6   : > { %s1492_s18 = smov 128   ;;  %s1493_s19 = smov 8  }
 0x1f7   : > { %1342 = dma.vmem_to_hbm [thread:$0]  (%p1554_p4), %s1648_s23, 1024, %s1646_s28, %s1654_s15, %s1492_s18, %s1492_s18, %s1493_s19  }
 0x1f8 PF: > { %p1348_p0 = scmp.ge.s32.totalorder %s1488_s17, 2  ;;  %s1051_s21 = sand.u32 1, %s1468_s12  }
 0x1f9   : > { %s1052_s26 = scalar_lea.sflag [#allocation3], %s1051_s21 }
 0x1fa   : > { %p1345_p1 = pnand %p1348_p0, %p1561_p8 }
 0x1fc   : > { %p1346_p2 = pneg %p1345_p1 }
 0x1fe   : > { %1463 = dma.done.wait (%p1346_p2), %s1052_s26, 1024  }
 0x1ff   : > { %1465 = vsyncadd (%p1346_p2), %s1052_s26, 4294966272  ;;  %s16_s17 = sadd.s32 1, %s1488_s17   ;;  %s1705_s12 = smov %s1472_s13 }
 0x200   : > { %p13_p3 = scmp.ge.s32.totalorder %s16_s17, 4   ;;  %s1706_s13 = smov %s1476_s14 }
 0x201   : > { %s1707_s14 = smov %s1567_s25  ;;  %s1708_s15 = smov %s1484_s16 }
 0x202   : > { %s1709_s16 = smov %s1711_s20  ;;  %15 = sbr.rel (!%p13_p3) target bundleno = 4 (0x4), region = 79 }
 0x207   :  { %1057 = vsyncpa [#allocation3], 1 }
 0x208   :  { %1059 = vsyncpa [#allocation3 + $0x1], 1 }

</bundles_post_ra>
